<compile_context>
chip_gen: v6e
topology: v6e:2x2x1
jax: 0.10.0
libtpu: 0.0.40
codegen_flags: <defaults>
</compile_context>

<pallas_src>
import functools

import jax
import jax.numpy as jnp
from jax import lax
from jax.experimental import pallas as pl
from jax.experimental.pallas import tpu as pltpu


def _soft_ce_kernel(*refs, tl, l_total, has_cw):
    """One grid block: log_softmax over C, weight, masked partial sum.

    pred_ref, label_ref : (1, C, TL)   VMEM tiles (lane axis = flattened H*W)
    cw_ref (optional)   : (1, C, 1)    class weights
    out_ref             : (1, 1, 8, 128) partial-sum block (value broadcast)
    """
    if has_cw:
        pred_ref, label_ref, cw_ref, out_ref = refs
    else:
        pred_ref, label_ref, out_ref = refs
        cw_ref = None

    x = pred_ref[...].astype(jnp.float32)                   # (1, C, TL)
    y = label_ref[...].astype(jnp.float32)                  # (1, C, TL)
    if cw_ref is not None:
        y = y * cw_ref[...].astype(jnp.float32)              # (1, C, 1) bcast

    # log_softmax over the channel axis (axis=1), per lane.
    m = jnp.max(x, axis=1, keepdims=True)                    # (1, 1, TL)
    z = x - m
    lse = jnp.log(jnp.sum(jnp.exp(z), axis=1, keepdims=True))
    loss = (z - lse) * y                                      # (1, C, TL)

    if l_total % tl != 0:
        # Ragged last lane-tile: zero out-of-range lanes (covers any NaN/inf
        # produced by stale VMEM in the padded tail -- select, not multiply).
        t = pl.program_id(1)
        lane = lax.broadcasted_iota(jnp.int32, (1, 1, tl), 2)
        mask = (t * tl + lane) < l_total
        loss = jnp.where(mask, loss, 0.0)

    partial = jnp.sum(loss)
    out_ref[...] = jnp.broadcast_to(partial, out_ref.shape).astype(jnp.float32)


@functools.partial(
    jax.jit, static_argnames=("reduction", "loss_weight", "max_block_bytes"))
def cross_entropy_with_soft_label_pallas(
    pred_nchw,
    label_nchw,
    class_weight=None,
    *,
    reduction="mean",
    loss_weight=1.0,
    max_block_bytes=2 * 1024 * 1024,
):
    """Pallas implementation of CrossEntropyLossWithSoftLabel.forward.

    pred_nchw, label_nchw : (N, C, H, W), identical shapes (f32 or bf16).
    class_weight          : optional (C,) vector.
    Returns a scalar ('mean' or 'sum' reduction).
    """
    assert pred_nchw.shape == label_nchw.shape
    N, C, H, W = pred_nchw.shape
    L = H * W

    # Free contiguous views; the channel axis stays put (NCHW-native).
    pred3d = pred_nchw.reshape(N, C, L)
    label3d = label_nchw.reshape(N, C, L)

    # Lane-tile size: ~max_block_bytes per input block, multiple of 128.
    # 2 inputs x 2 pipeline buffers x 2 MiB ~= 8 MiB -> fits the default
    # scoped-VMEM limit on v5e/v6e/v7x with headroom.
    bytes_per_lane = C * 4
    tl_budget = max(128, (max_block_bytes // bytes_per_lane // 128) * 128)
    TL = L if L <= tl_budget else tl_budget  # full extent is always legal
    T = pl.cdiv(L, TL)

    has_cw = class_weight is not None
    operands = [pred3d, label3d]
    in_specs = [
        pl.BlockSpec((1, C, TL), lambda n, t: (n, 0, t)),
        pl.BlockSpec((1, C, TL), lambda n, t: (n, 0, t)),
    ]
    if has_cw:
        cw = jnp.asarray(class_weight, jnp.float32).reshape(1, C, 1)
        operands.append(cw)
        in_specs.append(pl.BlockSpec((1, C, 1), lambda n, t: (0, 0, 0)))

    partials = pl.pallas_call(
        functools.partial(_soft_ce_kernel, tl=TL, l_total=L, has_cw=has_cw),
        out_shape=jax.ShapeDtypeStruct((N, T, 8, 128), jnp.float32),
        grid_spec=pltpu.PrefetchScalarGridSpec(
            num_scalar_prefetch=0,
            grid=(N, T),
            in_specs=in_specs,
            out_specs=pl.BlockSpec((1, 1, 8, 128), lambda n, t: (n, t, 0, 0)),
        ),
        compiler_params=pltpu.CompilerParams(
            dimension_semantics=("parallel", "parallel")),
    )(*operands)

    loss_sum = jnp.sum(partials[:, :, 0, 0])

    if reduction == "mean":
        loss = loss_sum / jnp.float32(N * C * H * W)
    elif reduction == "sum":
        loss = loss_sum
    else:
        # TODO(synk): reduction='none' needs the full (N,C,H,W) loss map as
        # the kernel output; not exercised by the default module config.
        raise NotImplementedError(reduction)
    # TODO(synk): elementwise `weight` / `avg_factor` re-normalization of
    # weight_reduce_loss is not implemented (both default to None).

    return jnp.float32(loss_weight) * loss


def _reference_jax(pred, label, class_weight=None, loss_weight=1.0):
    """Pure-JAX reference matching the PyTorch code (no negation, mean)."""
    logprobs = jax.nn.log_softmax(pred.astype(jnp.float32), axis=1)
    loss = logprobs * label.astype(jnp.float32)
    if class_weight is not None:
        loss = loss * jnp.asarray(class_weight, jnp.float32).reshape(1, -1, 1, 1)
    return jnp.float32(loss_weight) * jnp.mean(loss)


if __name__ == "__main__":
    key = jax.random.PRNGKey(0)
    k1, k2, k3, k4 = jax.random.split(key, 4)

    # Case 1: default config (no class_weight), single full-width lane tile.
    N, C, H, W = 2, 4, 16, 16
    cls_score = jax.random.normal(k1, (N, C, H, W), jnp.float32)
    label = jax.nn.softmax(jax.random.normal(k2, (N, C, H, W), jnp.float32), axis=1)

    out = cross_entropy_with_soft_label_pallas(cls_score, label)
    out = jax.block_until_ready(out)
    ref = _reference_jax(cls_score, label)
    assert jnp.allclose(out, ref, rtol=1e-5, atol=1e-5), (out, ref)

    # Case 2: class_weight + forced small lane tiles -> multi-block grid with
    # a ragged (masked) last tile, exercising the mask + parallel-partials path.
    N2, C2, H2, W2 = 2, 4, 16, 20            # L = 320 -> TL = 128, T = 3
    cls2 = jax.random.normal(k3, (N2, C2, H2, W2), jnp.float32)
    lab2 = jax.nn.softmax(
        jax.random.normal(k4, (N2, C2, H2, W2), jnp.float32), axis=1)
    cw = jnp.array([0.5, 1.0, 2.0, 1.5], jnp.float32)

    out2 = cross_entropy_with_soft_label_pallas(
        cls2, lab2, cw, max_block_bytes=2048)
    out2 = jax.block_until_ready(out2)
    ref2 = _reference_jax(cls2, lab2, class_weight=cw)
    assert jnp.allclose(out2, ref2, rtol=1e-5, atol=1e-5), (out2, ref2)

    print("KERNEL_OK")
</pallas_src>

<mosaic_0001>
module attributes {stable_mosaic.version = 11 : i64} {
  func.func @_soft_ce_kernel(%arg0: i32, %arg1: i32, %arg2: memref<1x4x256xf32, #tpu.memory_space<vmem>>, %arg3: memref<1x4x256xf32, #tpu.memory_space<vmem>>, %arg4: memref<1x1x8x128xf32, #tpu.memory_space<vmem>>) attributes {dimension_semantics = [#tpu.dimension_semantics<parallel>, #tpu.dimension_semantics<parallel>], iteration_bounds = array<i64: 2, 1>, scalar_prefetch = 0 : i64, scratch_operands = 0 : i64, tpu.core_type = #tpu.core_type<tc>, window_params = [{transform_indices = @transform_0, window_bounds = array<i64: 1, 4, 256>}, {transform_indices = @transform_1, window_bounds = array<i64: 1, 4, 256>}, {transform_indices = @transform_2, window_bounds = array<i64: 1, 1, 8, 128>}]} {
    %c0 = arith.constant 0 : index
    %c0_0 = arith.constant 0 : index
    %c0_1 = arith.constant 0 : index
    %0 = vector.load %arg2[%c0, %c0_0, %c0_1] : memref<1x4x256xf32, #tpu.memory_space<vmem>>, vector<1x4x256xf32>
    %c0_2 = arith.constant 0 : index
    %c0_3 = arith.constant 0 : index
    %c0_4 = arith.constant 0 : index
    %1 = vector.load %arg3[%c0_2, %c0_3, %c0_4] : memref<1x4x256xf32, #tpu.memory_space<vmem>>, vector<1x4x256xf32>
    %cst = arith.constant dense<0xFF800000> : vector<1x256xf32>
    %2 = vector.multi_reduction <maximumf>, %0, %cst [1] : vector<1x4x256xf32> to vector<1x256xf32>
    %3 = vector.shape_cast %2 : vector<1x256xf32> to vector<1x1x256xf32>
    %4 = vector.broadcast %3 : vector<1x1x256xf32> to vector<1x4x256xf32>
    %5 = arith.subf %0, %4 : vector<1x4x256xf32>
    %6 = math.exp %5 : vector<1x4x256xf32>
    %cst_5 = arith.constant dense<0.000000e+00> : vector<1x256xf32>
    %7 = vector.multi_reduction <add>, %6, %cst_5 [1] : vector<1x4x256xf32> to vector<1x256xf32>
    %8 = vector.shape_cast %7 : vector<1x256xf32> to vector<1x1x256xf32>
    %9 = math.log %8 : vector<1x1x256xf32>
    %10 = vector.broadcast %9 : vector<1x1x256xf32> to vector<1x4x256xf32>
    %11 = arith.subf %5, %10 : vector<1x4x256xf32>
    %12 = arith.mulf %11, %1 : vector<1x4x256xf32>
    %13 = vector.shape_cast %12 : vector<1x4x256xf32> to vector<1x1x4x256xf32>
    %cst_6 = arith.constant dense<0.000000e+00> : vector<1xf32>
    %14 = vector.multi_reduction <add>, %13, %cst_6 [1, 2, 3] : vector<1x1x4x256xf32> to vector<1xf32>
    %15 = vector.shape_cast %14 : vector<1xf32> to vector<1x1x1x1xf32>
    %16 = vector.extract %15[0, 0, 0, 0] : f32 from vector<1x1x1x1xf32>
    %17 = vector.broadcast %16 : f32 to vector<1x1x8x128xf32>
    %c0_7 = arith.constant 0 : index
    %c0_8 = arith.constant 0 : index
    %c0_9 = arith.constant 0 : index
    %c0_10 = arith.constant 0 : index
    %18 = vector.load %arg4[%c0_7, %c0_8, %c0_9, %c0_10] : memref<1x1x8x128xf32, #tpu.memory_space<vmem>>, vector<1x1x8x128xf32>
    tpu.vector_store %arg4[%c0_7, %c0_8, %c0_9, %c0_10], %17 {strides = array<i32>} : memref<1x1x8x128xf32, #tpu.memory_space<vmem>>, vector<1x1x8x128xf32>,
    return
  }
  func.func @transform_0(%arg0: i32, %arg1: i32) -> (i32, i32, i32) {
    %c0_i32 = arith.constant 0 : i32
    %c0_i32_0 = arith.constant 0 : i32
    return %arg0, %c0_i32, %arg1 : i32, i32, i32
  }
  func.func @transform_1(%arg0: i32, %arg1: i32) -> (i32, i32, i32) {
    %c0_i32 = arith.constant 0 : i32
    %c0_i32_0 = arith.constant 0 : i32
    return %arg0, %c0_i32, %arg1 : i32, i32, i32
  }
  func.func @transform_2(%arg0: i32, %arg1: i32) -> (i32, i32, i32, i32) {
    %c0_i32 = arith.constant 0 : i32
    %c0_i32_0 = arith.constant 0 : i32
    %c0_i32_1 = arith.constant 0 : i32
    return %arg0, %arg1, %c0_i32, %c0_i32_0 : i32, i32, i32, i32
  }
}

</mosaic_0001>

<bundles_post_ra>
// kernel: cross_entropy_with_soft_label_pallas.1
= control target key start
LH: loop header
LB: loop body
LE: loop exit
PB: predicated region body
PF: predicated region fallthrough
CT: control target
= control target key end

     0   :  { %s466_s9 = smov 0   ;;  %s468_s10 = smov 0   ;;  %s513_s0 = inlined_call_operand.vmem [shape: f32[2,4,256], index: 0, kind: input, shape index: {}]   ;;  %s514_s1 = inlined_call_operand.vmem [shape: f32[2,4,256], index: 1, kind: input, shape index: {}]   ;;  %s515_s2 = inlined_call_operand.vmem [shape: f32[2,1,8,128], index: 2, kind: output, shape index: {}]  }
   0x1   :  { %s470_s11 = smov 0  }
   0x2 LB: > { %s24_s12 = sadd.s32 1, %s445_s10  ;;  %p384_p0 = scmp.ge.s32.totalorder %s449_s11, 1  ;;  %s449_s11 = sphi %s470_s11, %s12_s11   ;;  %s445_s10 = sphi %s468_s10, %s517_s10   ;;  %s441_s9 = sphi %s466_s9, %s516_s9  }
   0x3   : > { %p26_p1 = scmp.ge.s32.totalorder %s24_s12, 2  ;;  %p150_p2 = scmp.lt.s32.totalorder %s449_s11, 3 }
   0x5   : > { %s519_s12 = smov (%p26_p1, %s24_s12), 0  ;;  %p151_p3 = pnand %p384_p0, %p150_p2 }
   0x6   : > { %p188_p4 = scmp.lt.s32.totalorder (!%p151_p3), %s441_s9, 1 }
   0x7   : > { %154 = sbr.rel (%p151_p3) target bundleno = 295 (0x127), region = 28 }
   0xc   : > { %s521_s9 = smov (!%p188_p4, %s441_s9), 1  ;;  %vm219_vm0 = vcmask 1043456  }
   0xd   : > { %s484_s13 = sshll.u32 %s521_s9, 3 }
   0xe   : > { %s195_s16 = scalar_lea.vmem %s513_s0, %s484_s13  ;;  %s205_s19 = scalar_lea.vmem %s514_s1, %s484_s13 }
   0xf   : > { %v214_v0 = vld [vmem:[%s195_s16] sm:$0xff]  ;;  %s213_s22 = scalar_lea.vmem %s515_s2, %s484_s13 }
  0x10   : > { %v217_v1 = vcombine.high %v214_v0, %v214_v0  ;;  %v220_v2 = vsel %vm219_vm0, %v214_v0, -inf  ;;  %v215_v40 = vld [vmem:[%s205_s19] sm:$0xff] }
  0x11   : > { %v221_v3 = vrot.slane %v220_v2, 4 }
  0x12   : > { %v227_v4 = vsel %vm219_vm0, %v217_v1, -inf }
  0x13   : > { %v222_v5 = vmax.f32 %v220_v2, %v221_v3  ;;  %v228_v6 = vrot.slane %v227_v4, 4 }
  0x15   : > { %v223_v7 = vrot.slane %v222_v5, 2  ;;  %v229_v8 = vmax.f32 %v227_v4, %v228_v6 }
  0x17   : > { %v224_v9 = vmax.f32 %v222_v5, %v223_v7  ;;  %v230_v10 = vrot.slane %v229_v8, 2 }
  0x19   : > { %v225_v11 = vrot.slane %v224_v9, 1  ;;  %v231_v12 = vmax.f32 %v229_v8, %v230_v10 }
  0x1b   : > { %v226_v13 = vmax.f32 %v224_v9, %v225_v11  ;;  %v232_v14 = vrot.slane %v231_v12, 1 }
  0x1d   : > { %v233_v15 = vmax.f32 %v231_v12, %v232_v14 }
  0x1f   : > { %v236_v16 = vcombine.low %v226_v13, %v233_v15 }
  0x21   : > { %v238_v17 = vsub.f32 %v214_v0, %v236_v16 }
  0x23   : > { %v239_v18 = vmul.f32 1.442695, %v238_v17 }
  0x25   : > { %421 = vpow2.f32 %v239_v18 }
  0x32   : > { %v422_v19 = vpop.eup %421 }
  0x33   : > { %v242_v20 = vcombine.high %v422_v19, %v422_v19  ;;  %v244_v21 = vsel %vm219_vm0, %v422_v19, 0.0 }
  0x34   : > { %v245_v22 = vrot.slane %v244_v21, 4 }
  0x35   : > { %v251_v23 = vsel %vm219_vm0, %v242_v20, 0.0 }
  0x36   : > { %v246_v24 = vadd.f32 %v245_v22, %v244_v21  ;;  %v252_v25 = vrot.slane %v251_v23, 4 }
  0x38   : > { %v247_v26 = vrot.slane %v246_v24, 2  ;;  %v253_v27 = vadd.f32 %v252_v25, %v251_v23 }
  0x3a   : > { %v248_v28 = vadd.f32 %v247_v26, %v246_v24  ;;  %v254_v29 = vrot.slane %v253_v27, 2 }
  0x3c   : > { %v249_v30 = vrot.slane %v248_v28, 1  ;;  %v255_v31 = vadd.f32 %v254_v29, %v253_v27 }
  0x3e   : > { %v250_v32 = vadd.f32 %v249_v30, %v248_v28  ;;  %v256_v33 = vrot.slane %v255_v31, 1 }
  0x40   : > { %v257_v34 = vadd.f32 %v256_v33, %v255_v31  ;;  %423 = vlog2.f32 %v250_v32 }
  0x42   : > { %425 = vlog2.f32 %v257_v34 }
  0x4d   : > { %v424_v35 = vpop.eup %423 }
  0x4e   : > { %v259_v36 = vmul.f32 0.6931472, %v424_v35 }
  0x4f   : > { %v426_v37 = vpop.eup %425 }
  0x50   : > { %v261_v38 = vmul.f32 0.6931472, %v426_v37 }
  0x52   : > { %v264_v39 = vcombine.low %v259_v36, %v261_v38 }
  0x54   : > { %v266_v41 = vsub.f32 %v238_v17, %v264_v39 }
  0x56   : > { %v267_v42 = vmul.f32 %v266_v41, %v215_v40 }
  0x58   : > { %v269_v43 = vcombine.high %v267_v42, %v267_v42  ;;  %v271_v44 = vsel %vm219_vm0, %v267_v42, 0.0 }
  0x5a   : > { %v272_v45 = vsel %vm219_vm0, %v269_v43, 0.0 }
  0x5b   : > { %v273_v46 = vadd.f32 %v272_v45, %v271_v44 }
  0x5d   : > { %274 = vadd.xlane.f32.xlu0 %v273_v46 }
  0xe6   : > { %v275_v47 = vpop.xlane.xlu0 %274 }
  0xe7   : > { %v276_v48 = vrot.slane %v275_v47, 4 }
  0xe9   : > { %v277_v49 = vadd.f32 %v276_v48, %v275_v47 }
  0xeb   : > { %v278_v50 = vrot.slane %v277_v49, 2 }
  0xed   : > { %v279_v51 = vadd.f32 %v278_v50, %v277_v49 }
  0xef   : > { %v280_v52 = vrot.slane %v279_v51, 1 }
  0xf1   : > { %v281_v53 = vadd.f32 %v280_v52, %v279_v51 }
  0xf3   : > { %394 = vpush %v281_v53 }
 0x124   : > { %s395_s23 = spop %394 }
 0x125   : > { %v283_v54 = vstv %s395_s23 }
 0x126   : > { %284 = vst [vmem:[%s213_s22] sm:$0xff] %v283_v54 }
 0x127 PF: > { %s12_s11 = sadd.s32 1, %s449_s11   ;;  %s516_s9 = smov %s445_s10 }
 0x128   : > { %p9_p5 = scmp.ge.s32.totalorder %s12_s11, 4   ;;  %s517_s10 = smov %s519_s12 }
 0x12a   :  { %11 = sbr.rel (!%p9_p5) target bundleno = 2 (0x2), region = 61 }

</bundles_post_ra>
